<compile_context>
chip_gen: v5e
topology: v5e:2x2
jax: 0.10.0
libtpu: 0.0.40
codegen_flags: <defaults>
</compile_context>

<pallas_src>
import functools

import jax
import jax.numpy as jnp
from jax.experimental import pallas as pl
from jax.experimental.pallas import tpu as pltpu

LN_EPS = 1e-5  # PyTorch nn.LayerNorm default


def _round_up(x, m):
    return ((x + m - 1) // m) * m


def baseline_net_kernel(x_ref, w1_ref, p_ref, w2_ref, o_ref, *, pack_rows):
    hidden_dim = w1_ref.shape[1]
    out_dim = w2_ref.shape[1]

    # ---- lin_1: (TM, in) @ (in, hidden); x arrives fp32, cast in-register ----
    x = x_ref[...].astype(w1_ref.dtype)
    h = jnp.dot(x, w1_ref[...], preferred_element_type=jnp.float32)
    h = h + p_ref[0:1, :hidden_dim]  # b1 (fp32), broadcasts over batch tile

    # ---- LayerNorm over last dim (biased variance, like torch), fp32 VPU ----
    mu = jnp.mean(h, axis=-1, keepdims=True)
    xc = h - mu
    var = jnp.mean(xc * xc, axis=-1, keepdims=True)
    h = xc * jax.lax.rsqrt(var + LN_EPS)
    h = h * p_ref[1:2, :hidden_dim] + p_ref[2:3, :hidden_dim]  # gamma, beta

    # ---- ReLU ----
    h = jnp.maximum(h, 0.0)

    # ---- lin_2: (TM, hidden) @ (hidden, out), fp32 accumulation ----
    out = jnp.dot(h.astype(w2_ref.dtype), w2_ref[...],
                  preferred_element_type=jnp.float32)
    out = out + p_ref[3:4, :out_dim]  # b2 (fp32)
    out = out.astype(o_ref.dtype)

    if pack_rows > 1:
        # Lane-dense packing: (block_m, out_dim) -> (block_m//r, r*out_dim==128).
        # Row-major reshape, so the wrapper-side reshape back is exact & free.
        out = out.reshape(o_ref.shape)
    o_ref[...] = out


@functools.partial(jax.jit, static_argnames=("block_m", "use_bf16", "pack_out"))
def baseline_net(x, w1, b1, w2, b2, gamma, beta, *,
                 block_m=None, use_bf16=True, pack_out=True):
    """x: (B, in_dim) float32.  Weights stored as w1 (in, hid), w2 (hid, out),
    equivalent to PyTorch's x @ W.T with W of shape (out, in)."""
    B, in_dim = x.shape
    hidden_dim = w1.shape[1]
    out_dim = w2.shape[1]

    # ---- pad batch only to the 8-row sublane granule ----
    B_pad = _round_up(B, 8)
    if B_pad != B:
        x = jnp.pad(x, ((0, B_pad - B), (0, 0)))

    # ---- batch tile: largest multiple-of-8 divisor of B_pad up to ~4096 rows ----
    if block_m is None:
        target = min(4096, B_pad)
        block_m = 8
        cand = (target // 8) * 8
        while cand >= 8:
            if B_pad % cand == 0:
                block_m = cand
                break
            cand -= 8
    block_m = max(8, min(block_m, B_pad))
    if B_pad % block_m != 0:
        # Explicit awkward block_m: pad the remainder (small cost; default path
        # never takes this branch since it picks a divisor of B_pad).
        new_pad = _round_up(B_pad, block_m)
        x = jnp.pad(x, ((0, new_pad - B_pad), (0, 0)))
        B_pad = new_pad
    # Keep >= 2 grid steps when cheap so the "parallel" batch axis can shard
    # across both TensorCores on v7x (harmless single extra step on v5e/v6e).
    if B_pad // block_m == 1 and block_m >= 16 and block_m % 16 == 0:
        block_m //= 2
    grid_m = B_pad // block_m

    # ---- lane-dense output packing factor ----
    pack_rows = 1
    if pack_out and out_dim < 128 and 128 % out_dim == 0:
        r = 128 // out_dim
        if block_m % (8 * r) == 0:
            pack_rows = r

    # ---- dtype policy: bf16 weights, fp32 x / accumulation / LayerNorm ----
    mm_dtype = jnp.bfloat16 if use_bf16 else jnp.float32
    w1_in = w1.astype(mm_dtype)
    w2_in = w2.astype(mm_dtype)

    # Pack b1 / gamma / beta / b2 into one (4, max(hidden, out)) fp32 block.
    pw = max(hidden_dim, out_dim)

    def _row(v, n):
        v = v.astype(jnp.float32)
        return jnp.pad(v, (0, pw - n)) if n < pw else v

    params = jnp.stack([_row(b1, hidden_dim), _row(gamma, hidden_dim),
                        _row(beta, hidden_dim), _row(b2, out_dim)], axis=0)

    if pack_rows > 1:
        out_shape = jax.ShapeDtypeStruct((B_pad // pack_rows, pack_rows * out_dim),
                                         jnp.float32)
        out_spec = pl.BlockSpec((block_m // pack_rows, pack_rows * out_dim),
                                lambda i: (i, 0))
    else:
        out_shape = jax.ShapeDtypeStruct((B_pad, out_dim), jnp.float32)
        out_spec = pl.BlockSpec((block_m, out_dim), lambda i: (i, 0))

    grid_spec = pltpu.PrefetchScalarGridSpec(
        num_scalar_prefetch=0,
        grid=(grid_m,),
        in_specs=[
            pl.BlockSpec((block_m, in_dim), lambda i: (i, 0)),       # x: batch-tiled, fp32
            pl.BlockSpec((in_dim, hidden_dim), lambda i: (0, 0)),    # w1: VMEM-resident
            pl.BlockSpec((4, pw), lambda i: (0, 0)),                 # [b1;gamma;beta;b2]
            pl.BlockSpec((hidden_dim, out_dim), lambda i: (0, 0)),   # w2: VMEM-resident
        ],
        out_specs=out_spec,
    )

    wbytes = jnp.dtype(mm_dtype).itemsize
    cost = pl.CostEstimate(
        flops=2 * B_pad * (in_dim * hidden_dim + hidden_dim * out_dim)
              + 10 * B_pad * hidden_dim,
        transcendentals=B_pad,  # one rsqrt per row
        bytes_accessed=(
            B_pad * in_dim * 4                                   # x (fp32 in)
            + B_pad * out_dim * 4                                # output
            + (in_dim * hidden_dim + hidden_dim * out_dim) * wbytes
            + 4 * pw * 4
        ),
    )

    out = pl.pallas_call(
        functools.partial(baseline_net_kernel, pack_rows=pack_rows),
        out_shape=out_shape,
        grid_spec=grid_spec,
        compiler_params=pltpu.CompilerParams(
            dimension_semantics=("parallel",),   # megacore-shardable on v7x
        ),
        cost_estimate=cost,
    )(x, w1_in, params, w2_in)

    if pack_rows > 1:
        out = out.reshape(B_pad, out_dim)
    return out[:B] if B_pad != B else out


def reference_net(x, w1, b1, w2, b2, gamma, beta):
    h = x @ w1 + b1
    mu = jnp.mean(h, axis=-1, keepdims=True)
    var = jnp.mean((h - mu) ** 2, axis=-1, keepdims=True)
    h = (h - mu) * jax.lax.rsqrt(var + LN_EPS) * gamma + beta
    h = jnp.maximum(h, 0.0)
    return h @ w2 + b2


if __name__ == "__main__":
    B, in_dim, hidden_dim, out_dim = 256, 32, 64, 16

    key = jax.random.PRNGKey(0)
    kx, kw1, kb1, kw2, kb2 = jax.random.split(key, 5)

    x = jax.random.normal(kx, (B, in_dim), dtype=jnp.float32)
    w1 = jax.random.normal(kw1, (in_dim, hidden_dim), dtype=jnp.float32) * (1.0 / in_dim ** 0.5)
    b1 = jax.random.normal(kb1, (hidden_dim,), dtype=jnp.float32) * 0.01
    w2 = jax.random.normal(kw2, (hidden_dim, out_dim), dtype=jnp.float32) * (1.0 / hidden_dim ** 0.5)
    b2 = jax.random.normal(kb2, (out_dim,), dtype=jnp.float32) * 0.01
    gamma = jnp.ones((hidden_dim,), dtype=jnp.float32)
    beta = jnp.zeros((hidden_dim,), dtype=jnp.float32)

    ref = reference_net(x, w1, b1, w2, b2, gamma, beta)

    def run(**kw):
        # Prefer the lane-dense packed-store path; fall back to the natural
        # (B, out_dim) layout if the in-kernel relayout fails to lower on this
        # Mosaic build.  Correctness is identical on both paths.
        try:
            return jax.block_until_ready(
                baseline_net(x, w1, b1, w2, b2, gamma, beta, pack_out=True, **kw))
        except Exception:
            return jax.block_until_ready(
                baseline_net(x, w1, b1, w2, b2, gamma, beta, pack_out=False, **kw))

    # fp32 path: must match the fp32 reference tightly.
    out_f32 = run(use_bf16=False)
    assert out_f32.shape == (B, out_dim)
    assert jnp.allclose(out_f32, ref, atol=1e-4, rtol=1e-4), "fp32 mismatch vs reference"

    # bf16-weight path (default, perf mode): bf16 MXU operands, fp32 accumulation
    # & fp32 LayerNorm.  Tolerance reflects bf16 operand rounding.
    out_bf16 = run(use_bf16=True)
    assert out_bf16.shape == (B, out_dim)
    assert jnp.allclose(out_bf16, ref, atol=5e-2, rtol=5e-2), "bf16 mismatch vs reference"

    print("KERNEL_OK")
</pallas_src>

<mosaic_0001>
module attributes {stable_mosaic.version = 11 : i64} {
  func.func @baseline_net_kernel(%arg0: i32, %arg1: memref<128x32xf32, #tpu.memory_space<vmem>>, %arg2: memref<32x64xf32, #tpu.memory_space<vmem>>, %arg3: memref<4x64xf32, #tpu.memory_space<vmem>>, %arg4: memref<64x16xf32, #tpu.memory_space<vmem>>, %arg5: memref<16x128xf32, #tpu.memory_space<vmem>>) attributes {dimension_semantics = [#tpu.dimension_semantics<parallel>], iteration_bounds = array<i64: 2>, scalar_prefetch = 0 : i64, scratch_operands = 0 : i64, tpu.core_type = #tpu.core_type<tc>, window_params = [{transform_indices = @transform_0, window_bounds = array<i64: 128, 32>}, {pipeline_mode = #tpu.pipeline_mode<synchronous>, transform_indices = @transform_1, window_bounds = array<i64: 32, 64>}, {pipeline_mode = #tpu.pipeline_mode<synchronous>, transform_indices = @transform_2, window_bounds = array<i64: 4, 64>}, {pipeline_mode = #tpu.pipeline_mode<synchronous>, transform_indices = @transform_3, window_bounds = array<i64: 64, 16>}, {transform_indices = @transform_4, window_bounds = array<i64: 16, 128>}]} {
    %c0 = arith.constant 0 : index
    %c0_0 = arith.constant 0 : index
    %0 = vector.load %arg1[%c0, %c0_0] : memref<128x32xf32, #tpu.memory_space<vmem>>, vector<128x32xf32>
    %c0_1 = arith.constant 0 : index
    %c0_2 = arith.constant 0 : index
    %1 = vector.load %arg2[%c0_1, %c0_2] : memref<32x64xf32, #tpu.memory_space<vmem>>, vector<32x64xf32>
    %cst = arith.constant dense<0.000000e+00> : vector<128x64xf32>
    %2 = tpu.matmul %0, %1, %cst {dimension_numbers = #tpu.dot_dimension_numbers<[1], [0], [0], [1], [0, 0, 1, 1], [], []>} : vector<128x32xf32>, vector<32x64xf32>, vector<128x64xf32> -> vector<128x64xf32>
    %c0_3 = arith.constant 0 : index
    %c0_4 = arith.constant 0 : index
    %3 = vector.load %arg3[%c0_3, %c0_4] : memref<4x64xf32, #tpu.memory_space<vmem>>, vector<1x64xf32>
    %4 = vector.broadcast %3 : vector<1x64xf32> to vector<128x64xf32>
    %5 = arith.addf %2, %4 : vector<128x64xf32>
    %cst_5 = arith.constant dense<0.000000e+00> : vector<128xf32>
    %6 = vector.multi_reduction <add>, %5, %cst_5 [1] : vector<128x64xf32> to vector<128xf32>
    %7 = vector.shape_cast %6 : vector<128xf32> to vector<128x1xf32>
    %cst_6 = arith.constant 6.400000e+01 : f32
    %8 = vector.broadcast %cst_6 : f32 to vector<128x1xf32>
    %9 = arith.divf %7, %8 : vector<128x1xf32>
    %10 = vector.broadcast %9 : vector<128x1xf32> to vector<128x64xf32>
    %11 = arith.subf %5, %10 : vector<128x64xf32>
    %12 = arith.mulf %11, %11 : vector<128x64xf32>
    %cst_7 = arith.constant dense<0.000000e+00> : vector<128xf32>
    %13 = vector.multi_reduction <add>, %12, %cst_7 [1] : vector<128x64xf32> to vector<128xf32>
    %14 = vector.shape_cast %13 : vector<128xf32> to vector<128x1xf32>
    %cst_8 = arith.constant 6.400000e+01 : f32
    %15 = vector.broadcast %cst_8 : f32 to vector<128x1xf32>
    %16 = arith.divf %14, %15 : vector<128x1xf32>
    %cst_9 = arith.constant 9.99999974E-6 : f32
    %17 = vector.broadcast %cst_9 : f32 to vector<128x1xf32>
    %18 = arith.addf %16, %17 : vector<128x1xf32>
    %19 = math.rsqrt %18 : vector<128x1xf32>
    %20 = vector.broadcast %19 : vector<128x1xf32> to vector<128x64xf32>
    %21 = arith.mulf %11, %20 : vector<128x64xf32>
    %c1 = arith.constant 1 : index
    %c0_10 = arith.constant 0 : index
    %22 = vector.load %arg3[%c1, %c0_10] : memref<4x64xf32, #tpu.memory_space<vmem>>, vector<1x64xf32>
    %23 = vector.broadcast %22 : vector<1x64xf32> to vector<128x64xf32>
    %24 = arith.mulf %21, %23 : vector<128x64xf32>
    %c2 = arith.constant 2 : index
    %c0_11 = arith.constant 0 : index
    %25 = vector.load %arg3[%c2, %c0_11] : memref<4x64xf32, #tpu.memory_space<vmem>>, vector<1x64xf32>
    %26 = vector.broadcast %25 : vector<1x64xf32> to vector<128x64xf32>
    %27 = arith.addf %24, %26 : vector<128x64xf32>
    %cst_12 = arith.constant 0.000000e+00 : f32
    %28 = vector.broadcast %cst_12 : f32 to vector<128x64xf32>
    %29 = arith.maximumf %27, %28 : vector<128x64xf32>
    %c0_13 = arith.constant 0 : index
    %c0_14 = arith.constant 0 : index
    %30 = vector.load %arg4[%c0_13, %c0_14] : memref<64x16xf32, #tpu.memory_space<vmem>>, vector<64x16xf32>
    %cst_15 = arith.constant dense<0.000000e+00> : vector<128x16xf32>
    %31 = tpu.matmul %29, %30, %cst_15 {dimension_numbers = #tpu.dot_dimension_numbers<[1], [0], [0], [1], [0, 0, 1, 1], [], []>} : vector<128x64xf32>, vector<64x16xf32>, vector<128x16xf32> -> vector<128x16xf32>
    %c3 = arith.constant 3 : index
    %c0_16 = arith.constant 0 : index
    %32 = vector.load %arg3[%c3, %c0_16] : memref<4x64xf32, #tpu.memory_space<vmem>>, vector<1x16xf32>
    %33 = vector.broadcast %32 : vector<1x16xf32> to vector<128x16xf32>
    %34 = arith.addf %31, %33 : vector<128x16xf32>
    %35 = vector.shape_cast %34 : vector<128x16xf32> to vector<16x128xf32>
    %c0_17 = arith.constant 0 : index
    %c0_18 = arith.constant 0 : index
    %36 = vector.load %arg5[%c0_17, %c0_18] : memref<16x128xf32, #tpu.memory_space<vmem>>, vector<16x128xf32>
    tpu.vector_store %arg5[%c0_17, %c0_18], %35 {strides = array<i32>} : memref<16x128xf32, #tpu.memory_space<vmem>>, vector<16x128xf32>,
    return
  }
  func.func @transform_0(%arg0: i32) -> (i32, i32) {
    %c0_i32 = arith.constant 0 : i32
    %c0_i32_0 = arith.constant 0 : i32
    return %arg0, %c0_i32 : i32, i32
  }
  func.func @transform_1(%arg0: i32) -> (i32, i32) {
    %c0_i32 = arith.constant 0 : i32
    %c0_i32_0 = arith.constant 0 : i32
    %c0_i32_1 = arith.constant 0 : i32
    return %c0_i32, %c0_i32_0 : i32, i32
  }
  func.func @transform_2(%arg0: i32) -> (i32, i32) {
    %c0_i32 = arith.constant 0 : i32
    %c0_i32_0 = arith.constant 0 : i32
    %c0_i32_1 = arith.constant 0 : i32
    return %c0_i32, %c0_i32_0 : i32, i32
  }
  func.func @transform_3(%arg0: i32) -> (i32, i32) {
    %c0_i32 = arith.constant 0 : i32
    %c0_i32_0 = arith.constant 0 : i32
    %c0_i32_1 = arith.constant 0 : i32
    return %c0_i32, %c0_i32_0 : i32, i32
  }
  func.func @transform_4(%arg0: i32) -> (i32, i32) {
    %c0_i32 = arith.constant 0 : i32
    %c0_i32_0 = arith.constant 0 : i32
    return %arg0, %c0_i32 : i32, i32
  }
}

module attributes {stable_mosaic.version = 11 : i64} {
  func.func @baseline_net_kernel(%arg0: i32, %arg1: memref<128x32xf32, #tpu.memory_space<vmem>>, %arg2: memref<32x64xf32, #tpu.memory_space<vmem>>, %arg3: memref<4x64xf32, #tpu.memory_space<vmem>>, %arg4: memref<64x16xf32, #tpu.memory_space<vmem>>, %arg5: memref<128x16xf32, #tpu.memory_space<vmem>>) attributes {dimension_semantics = [#tpu.dimension_semantics<parallel>], iteration_bounds = array<i64: 2>, scalar_prefetch = 0 : i64, scratch_operands = 0 : i64, tpu.core_type = #tpu.core_type<tc>, window_params = [{transform_indices = @transform_0, window_bounds = array<i64: 128, 32>}, {pipeline_mode = #tpu.pipeline_mode<synchronous>, transform_indices = @transform_1, window_bounds = array<i64: 32, 64>}, {pipeline_mode = #tpu.pipeline_mode<synchronous>, transform_indices = @transform_2, window_bounds = array<i64: 4, 64>}, {pipeline_mode = #tpu.pipeline_mode<synchronous>, transform_indices = @transform_3, window_bounds = array<i64: 64, 16>}, {transform_indices = @transform_4, window_bounds = array<i64: 128, 16>}]} {
    %c0 = arith.constant 0 : index
    %c0_0 = arith.constant 0 : index
    %0 = vector.load %arg1[%c0, %c0_0] : memref<128x32xf32, #tpu.memory_space<vmem>>, vector<128x32xf32>
    %c0_1 = arith.constant 0 : index
    %c0_2 = arith.constant 0 : index
    %1 = vector.load %arg2[%c0_1, %c0_2] : memref<32x64xf32, #tpu.memory_space<vmem>>, vector<32x64xf32>
    %cst = arith.constant dense<0.000000e+00> : vector<128x64xf32>
    %2 = tpu.matmul %0, %1, %cst {dimension_numbers = #tpu.dot_dimension_numbers<[1], [0], [0], [1], [0, 0, 1, 1], [], []>} : vector<128x32xf32>, vector<32x64xf32>, vector<128x64xf32> -> vector<128x64xf32>
    %c0_3 = arith.constant 0 : index
    %c0_4 = arith.constant 0 : index
    %3 = vector.load %arg3[%c0_3, %c0_4] : memref<4x64xf32, #tpu.memory_space<vmem>>, vector<1x64xf32>
    %4 = vector.broadcast %3 : vector<1x64xf32> to vector<128x64xf32>
    %5 = arith.addf %2, %4 : vector<128x64xf32>
    %cst_5 = arith.constant dense<0.000000e+00> : vector<128xf32>
    %6 = vector.multi_reduction <add>, %5, %cst_5 [1] : vector<128x64xf32> to vector<128xf32>
    %7 = vector.shape_cast %6 : vector<128xf32> to vector<128x1xf32>
    %cst_6 = arith.constant 6.400000e+01 : f32
    %8 = vector.broadcast %cst_6 : f32 to vector<128x1xf32>
    %9 = arith.divf %7, %8 : vector<128x1xf32>
    %10 = vector.broadcast %9 : vector<128x1xf32> to vector<128x64xf32>
    %11 = arith.subf %5, %10 : vector<128x64xf32>
    %12 = arith.mulf %11, %11 : vector<128x64xf32>
    %cst_7 = arith.constant dense<0.000000e+00> : vector<128xf32>
    %13 = vector.multi_reduction <add>, %12, %cst_7 [1] : vector<128x64xf32> to vector<128xf32>
    %14 = vector.shape_cast %13 : vector<128xf32> to vector<128x1xf32>
    %cst_8 = arith.constant 6.400000e+01 : f32
    %15 = vector.broadcast %cst_8 : f32 to vector<128x1xf32>
    %16 = arith.divf %14, %15 : vector<128x1xf32>
    %cst_9 = arith.constant 9.99999974E-6 : f32
    %17 = vector.broadcast %cst_9 : f32 to vector<128x1xf32>
    %18 = arith.addf %16, %17 : vector<128x1xf32>
    %19 = math.rsqrt %18 : vector<128x1xf32>
    %20 = vector.broadcast %19 : vector<128x1xf32> to vector<128x64xf32>
    %21 = arith.mulf %11, %20 : vector<128x64xf32>
    %c1 = arith.constant 1 : index
    %c0_10 = arith.constant 0 : index
    %22 = vector.load %arg3[%c1, %c0_10] : memref<4x64xf32, #tpu.memory_space<vmem>>, vector<1x64xf32>
    %23 = vector.broadcast %22 : vector<1x64xf32> to vector<128x64xf32>
    %24 = arith.mulf %21, %23 : vector<128x64xf32>
    %c2 = arith.constant 2 : index
    %c0_11 = arith.constant 0 : index
    %25 = vector.load %arg3[%c2, %c0_11] : memref<4x64xf32, #tpu.memory_space<vmem>>, vector<1x64xf32>
    %26 = vector.broadcast %25 : vector<1x64xf32> to vector<128x64xf32>
    %27 = arith.addf %24, %26 : vector<128x64xf32>
    %cst_12 = arith.constant 0.000000e+00 : f32
    %28 = vector.broadcast %cst_12 : f32 to vector<128x64xf32>
    %29 = arith.maximumf %27, %28 : vector<128x64xf32>
    %c0_13 = arith.constant 0 : index
    %c0_14 = arith.constant 0 : index
    %30 = vector.load %arg4[%c0_13, %c0_14] : memref<64x16xf32, #tpu.memory_space<vmem>>, vector<64x16xf32>
    %cst_15 = arith.constant dense<0.000000e+00> : vector<128x16xf32>
    %31 = tpu.matmul %29, %30, %cst_15 {dimension_numbers = #tpu.dot_dimension_numbers<[1], [0], [0], [1], [0, 0, 1, 1], [], []>} : vector<128x64xf32>, vector<64x16xf32>, vector<128x16xf32> -> vector<128x16xf32>
    %c3 = arith.constant 3 : index
    %c0_16 = arith.constant 0 : index
    %32 = vector.load %arg3[%c3, %c0_16] : memref<4x64xf32, #tpu.memory_space<vmem>>, vector<1x16xf32>
    %33 = vector.broadcast %32 : vector<1x16xf32> to vector<128x16xf32>
    %34 = arith.addf %31, %33 : vector<128x16xf32>
    %c0_17 = arith.constant 0 : index
    %c0_18 = arith.constant 0 : index
    %35 = vector.load %arg5[%c0_17, %c0_18] : memref<128x16xf32, #tpu.memory_space<vmem>>, vector<128x16xf32>
    tpu.vector_store %arg5[%c0_17, %c0_18], %34 {strides = array<i32>} : memref<128x16xf32, #tpu.memory_space<vmem>>, vector<128x16xf32>,
    return
  }
  func.func @transform_0(%arg0: i32) -> (i32, i32) {
    %c0_i32 = arith.constant 0 : i32
    %c0_i32_0 = arith.constant 0 : i32
    return %arg0, %c0_i32 : i32, i32
  }
  func.func @transform_1(%arg0: i32) -> (i32, i32) {
    %c0_i32 = arith.constant 0 : i32
    %c0_i32_0 = arith.constant 0 : i32
    %c0_i32_1 = arith.constant 0 : i32
    return %c0_i32, %c0_i32_0 : i32, i32
  }
  func.func @transform_2(%arg0: i32) -> (i32, i32) {
    %c0_i32 = arith.constant 0 : i32
    %c0_i32_0 = arith.constant 0 : i32
    %c0_i32_1 = arith.constant 0 : i32
    return %c0_i32, %c0_i32_0 : i32, i32
  }
  func.func @transform_3(%arg0: i32) -> (i32, i32) {
    %c0_i32 = arith.constant 0 : i32
    %c0_i32_0 = arith.constant 0 : i32
    %c0_i32_1 = arith.constant 0 : i32
    return %c0_i32, %c0_i32_0 : i32, i32
  }
  func.func @transform_4(%arg0: i32) -> (i32, i32) {
    %c0_i32 = arith.constant 0 : i32
    %c0_i32_0 = arith.constant 0 : i32
    return %arg0, %c0_i32 : i32, i32
  }
}

</mosaic_0001>

<bundles_post_ra>
// kernel: baseline_net.1
= control target key start
LH: loop header
LB: loop body
LE: loop exit
PB: predicated region body
PF: predicated region fallthrough
CT: control target
= control target key end

     0   :  { %s1081_s15 = smov 0   ;;  %s1641_s0 = inlined_call_operand.vmem [shape: f32[256,32], index: 0, kind: input, shape index: {}]   ;;  %s1642_s1 = inlined_call_operand.vmem [shape: f32[32,64], index: 1, kind: input, shape index: {}]   ;;  %s1643_s2 = inlined_call_operand.vmem [shape: f32[4,64], index: 2, kind: input, shape index: {}]   ;;  %s1644_s3 = inlined_call_operand.vmem [shape: f32[64,16], index: 3, kind: input, shape index: {}]   ;;  %s1645_s4 = inlined_call_operand.vmem [shape: f32[256,16], index: 4, kind: output, shape index: {}]  }
   0x1 LB: > { %s945_s16 = sadd.s32 4294967295, %s1053_s15   ;;  %p949_p0 = scmp.ge.s32.totalorder %s1053_s15, 1  ;;  %s1053_s15 = sphi %s1081_s15, %s14_s15  }
   0x2   : > { %p163_p1 = scmp.lt.s32.totalorder %s1053_s15, 3 }
   0x4   : > { %p164_p2 = pnand %p949_p0, %p163_p1 }
   0x5   : > { %s950_s21 = sshll.u32 (!%p164_p2), %s945_s16, 4 }
   0x6   : > { %167 = sbr.rel (%p164_p2) target bundleno = 755 (0x2f3), region = 36  ;;  %p190_p3 = scmp.lt.s32.totalorder (!%p164_p2), %s950_s21, 31 }
   0xb   : > { %v220_v0 = vld [vmem:[%s1642_s1 + $0x18] sm:$0xff]  ;;  %v219_v1 = vld [vmem:[%s1642_s1 + $0x10] sm:$0xff]  ;;  %v218_v2 = vld [vmem:[%s1642_s1 + $0x8] sm:$0xff]  ;;  %s1659_s21 = smov (!%p190_p3, %s950_s21), 31  ;;  %vm223_vm0 = vcmask 261120   ;;  %vm337_vm1 = vcmask 523264  }
   0xc   : > { %284 = vmatpush.msra.mxu0 %v220_v0  ;;  %988 = vmatpush.msra.mxu3 %v220_v0  ;;  %v217_v3 = vld [vmem:[%s1642_s1] sm:$0xff]  ;;  %s951_s26 = sshll.u32 %s1659_s21, 3  ;;  %v1055_v62 = vmov 64.0  }
   0xd   : > { %s1109_s29 = scalar_lea.vmem %s1641_s0, %s951_s26  ;;  %v1144_v20 = vld [vmem:[%s1643_s2] ss:$0 sm:$0xff]  ;;  %1013 = vrcp.f32 %v1055_v62  ;;  %s1599_s7 = scalar_lea.vmem %s1645_s4, %s951_s26 }
   0xe   : > { %285 = vmatpush.msra.mxu0 %v219_v1  ;;  %989 = vmatpush.msra.mxu3 %v219_v1  ;;  %v201_v4 = vld [vmem:[%s1109_s29] sm:$0xff]  ;;  %v210_v5 = vld [vmem:[%s1109_s29 + $0x48] sm:$0xff]  ;;  %v211_v7 = vld [vmem:[%s1109_s29 + $0x50] sm:$0xff] }
   0xf   : > { %v202_v6 = vld [vmem:[%s1109_s29 + $0x8] sm:$0xff]  ;;  %v203_v8 = vld [vmem:[%s1109_s29 + $0x10] sm:$0xff]  ;;  %v212_v9 = vld [vmem:[%s1109_s29 + $0x58] sm:$0xff] }
  0x10   : > { %286 = vmatpush.msra.mxu0 %v218_v2  ;;  %990 = vmatpush.msra.mxu3 %v218_v2  ;;  %v204_v10 = vld [vmem:[%s1109_s29 + $0x18] sm:$0xff]  ;;  %v213_v11 = vld [vmem:[%s1109_s29 + $0x60] sm:$0xff]  ;;  %v214_v13 = vld [vmem:[%s1109_s29 + $0x68] sm:$0xff] }
  0x11   : > { %v205_v12 = vld [vmem:[%s1109_s29 + $0x20] sm:$0xff]  ;;  %v206_v14 = vld [vmem:[%s1109_s29 + $0x28] sm:$0xff]  ;;  %v215_v15 = vld [vmem:[%s1109_s29 + $0x70] sm:$0xff] }
  0x12   : > { %287 = vmatpush.msra.mxu0 %v217_v3  ;;  %991 = vmatpush.msra.mxu3 %v217_v3  ;;  %v207_v16 = vld [vmem:[%s1109_s29 + $0x30] sm:$0xff]  ;;  %v208_v17 = vld [vmem:[%s1109_s29 + $0x38] sm:$0xff]  ;;  %v209_v18 = vld [vmem:[%s1109_s29 + $0x40] sm:$0xff] }
  0x13   : > { %954 = vmatmul.msk.f32.vlgmr.msra.gmra.mxu0 %vm223_vm0, %v201_v4  ;;  %963 = vmatmul.msk.f32.vlgmr.msra.gmra.mxu3 %vm223_vm0, %v210_v5  ;;  %v216_v41 = vld [vmem:[%s1109_s29 + $0x78] sm:$0xff]  ;;  %v1014_v63 = vpop.eup %1013 }
  0x14   : > { %v387_v0 = vmul.f32 64.0, %v1014_v63  ;;  %vm391_vm2 = vweird.f32 %v1014_v63 }
  0x16   : > { %v388_v1 = vsub.f32 1.0, %v387_v0 }
  0x18   : > { %v389_v2 = vmul.f32 %v1014_v63, %v388_v1 }
  0x1a   : > { %v390_v3 = vadd.f32 %v1014_v63, %v389_v2 }
  0x1b   : > { %955 = vmatmul.msk.f32.gmra.mxu0 %vm223_vm0, %v202_v6  ;;  %964 = vmatmul.msk.f32.gmra.mxu3 %vm223_vm0, %v211_v7 }
  0x1c   : > { %v1204_v4 = vsel %vm391_vm2, %v1014_v63, %v390_v3 }
  0x23   : > { %956 = vmatmul.msk.f32.gmra.mxu0 %vm223_vm0, %v203_v8  ;;  %965 = vmatmul.msk.f32.gmra.mxu3 %vm223_vm0, %v212_v9 }
  0x2b   : > { %957 = vmatmul.msk.f32.gmra.mxu0 %vm223_vm0, %v204_v10  ;;  %966 = vmatmul.msk.f32.gmra.mxu3 %vm223_vm0, %v213_v11 }
  0x33   : > { %958 = vmatmul.msk.f32.gmra.mxu0 %vm223_vm0, %v205_v12  ;;  %967 = vmatmul.msk.f32.gmra.mxu3 %vm223_vm0, %v214_v13 }
  0x3b   : > { %959 = vmatmul.msk.f32.gmra.mxu0 %vm223_vm0, %v206_v14  ;;  %968 = vmatmul.msk.f32.gmra.mxu3 %vm223_vm0, %v215_v15 }
  0x43   : > { %960 = vmatmul.msk.f32.gmra.mxu0 %vm223_vm0, %v207_v16  ;;  %969 = vmatmul.msk.f32.gmra.mxu3 %vm223_vm0, %v216_v41 }
  0x4b   : > { %961 = vmatmul.msk.f32.gmra.mxu0 %vm223_vm0, %v208_v17 }
  0x53   : > { %962 = vmatmul.msk.f32.gmra.mxu0 %vm223_vm0, %v209_v18 }
  0x90   : > { %v289_v19 = vpop.f32.mrf.mxu0 }
  0x91   : > { %v290_v56 = vadd.f32 %v1144_v20, %v289_v19 }
  0x93   : > { %v338_v57 = vsel %vm337_vm1, %v290_v56, 0.0 }
  0x96   : > { %v316_v21 = vpop.f32.mrf.mxu3 }
  0x97   : > { %v1147_v22 = vadd.f32 %v1144_v20, %v316_v21 }
  0x98   : > { %v292_v23 = vpop.f32.mrf.mxu0 }
  0x99   : > { %v365_v24 = vsel %vm337_vm1, %v1147_v22, 0.0  ;;  %v1152_v25 = vadd.f32 %v1144_v20, %v292_v23 }
  0x9a   : > { %366 = vadd.xlane.f32.xlu1 %v365_v24 }
  0x9b   : > { %v341_v30 = vsel %vm337_vm1, %v1152_v25, 0.0 }
  0x9e   : > { %v319_v26 = vpop.f32.mrf.mxu3 }
  0x9f   : > { %v1155_v27 = vadd.f32 %v1144_v20, %v319_v26 }
  0xa0   : > { %v295_v28 = vpop.f32.mrf.mxu0 }
  0xa1   : > { %v368_v29 = vsel %vm337_vm1, %v1155_v27, 0.0  ;;  %v1162_v31 = vadd.f32 %v1144_v20, %v295_v28 }
  0xa2   : > { %369 = vadd.xlane.f32.xlu2 %v368_v29  ;;  %342 = vadd.xlane.f32.xlu1 %v341_v30 }
  0xa3   : > { %v344_v35 = vsel %vm337_vm1, %v1162_v31, 0.0 }
  0xa6   : > { %v322_v32 = vpop.f32.mrf.mxu3 }
  0xa7   : > { %v323_v58 = vadd.f32 %v1144_v20, %v322_v32 }
  0xa8   : > { %v298_v33 = vpop.f32.mrf.mxu0 }
  0xa9   : > { %v1165_v34 = vadd.f32 %v1144_v20, %v298_v33  ;;  %v371_v59 = vsel %vm337_vm1, %v323_v58, 0.0 }
  0xaa   : > { %345 = vadd.xlane.f32.xlu2 %v344_v35 }
  0xab   : > { %v347_v36 = vsel %vm337_vm1, %v1165_v34, 0.0 }
  0xac   : > { %348 = vadd.xlane.f32.xlu1 %v347_v36 }
  0xae   : > { %v325_v37 = vpop.f32.mrf.mxu3 }
  0xaf   : > { %v1172_v38 = vadd.f32 %v1144_v20, %v325_v37 }
  0xb0   : > { %v301_v39 = vpop.f32.mrf.mxu0 }
  0xb1   : > { %v374_v40 = vsel %vm337_vm1, %v1172_v38, 0.0  ;;  %v1200_v60 = vadd.f32 %v1144_v20, %v301_v39 }
  0xb2   : > { %375 = vadd.xlane.f32.xlu2 %v374_v40 }
  0xb3   : > { %v350_v61 = vsel %vm337_vm1, %v1200_v60, 0.0 }
  0xb6   : > { %v328_v42 = vpop.f32.mrf.mxu3 }
  0xb7   : > { %v1179_v43 = vadd.f32 %v1144_v20, %v328_v42 }
  0xb8   : > { %v304_v44 = vpop.f32.mrf.mxu0 }
  0xb9   : > { %v1182_v45 = vadd.f32 %v1144_v20, %v304_v44  ;;  %v377_v46 = vsel %vm337_vm1, %v1179_v43, 0.0 }
  0xba   : > { %378 = vadd.xlane.f32.xlu1 %v377_v46 }
  0xbb   : > { %v353_v47 = vsel %vm337_vm1, %v1182_v45, 0.0 }
  0xbc   : > { %354 = vadd.xlane.f32.xlu2 %v353_v47 }
  0xbe   : > { %v331_v48 = vpop.f32.mrf.mxu3 }
  0xbf   : > { %v1189_v49 = vadd.f32 %v1144_v20, %v331_v48 }
  0xc0   : > { %v307_v50 = vpop.f32.mrf.mxu0 }
  0xc1   : > { %v380_v51 = vsel %vm337_vm1, %v1189_v49, 0.0  ;;  %v1226_v23 = vadd.f32 %v1144_v20, %v307_v50 }
  0xc2   : > { %381 = vadd.xlane.f32.xlu1 %v380_v51 }
  0xc3   : > { %v356_v35 = vsel %vm337_vm1, %v1226_v23, 0.0 }
  0xc6   : > { %v334_v30 = vpop.f32.mrf.mxu3 }
  0xc7   : > { %v1241_v40 = vadd.f32 %v1144_v20, %v334_v30  ;;  %v755_v30 = vld [vmem:[%s1644_s3 + $0x30] sm:$0xff] }
  0xc8   : > { %v310_v52 = vpop.f32.mrf.mxu0 }
  0xc9   : > { %v1214_v10 = vadd.f32 %v1144_v20, %v310_v52  ;;  %v383_v46 = vsel %vm337_vm1, %v1241_v40, 0.0 }
  0xcb   : > { %v359_v11 = vsel %vm337_vm1, %v1214_v10, 0.0 }
  0xd0   : > { %v313_v53 = vpop.f32.mrf.mxu0 }
  0xd1   : > { %v314_v54 = vadd.f32 %v1144_v20, %v313_v53 }
  0xd3   : > { %v362_v55 = vsel %vm337_vm1, %v314_v54, 0.0 }
  0xd4   : > { %363 = vadd.xlane.f32.xlu0 %v362_v55 }
  0xdc   : > { %339 = vadd.xlane.f32.xlu0 %v338_v57 }
  0xe4   : > { %372 = vadd.xlane.f32.xlu0 %v371_v59 }
  0xec   : > { %351 = vadd.xlane.f32.xlu0 %v350_v61 }
 0x10d   : > { %v367_v5 = vpop.xlane.xlu1 %366 }
 0x10e   : > { %v402_v6 = vmul.f32 %v1204_v4, %v367_v5 }
 0x110   : > { %v1208_v7 = vsub.f32 %v1147_v22, %v402_v6 }
 0x112   : > { %v434_v8 = vmul.f32 %v1208_v7, %v1208_v7 }
 0x114   : > { %v468_v9 = vsel %vm337_vm1, %v434_v8, 0.0 }
 0x115   : > { %469 = vadd.xlane.f32.xlu1 %v468_v9  ;;  %v343_v12 = vpop.xlane.xlu1 %342  ;;  %v370_v16 = vpop.xlane.xlu2 %369 }
 0x116   : > { %v394_v24 = vmul.f32 %v1204_v4, %v343_v12  ;;  %v403_v41 = vmul.f32 %v1204_v4, %v370_v16 }
 0x118   : > { %v1234_v32 = vsub.f32 %v1152_v25, %v394_v24  ;;  %v1254_v48 = vsub.f32 %v1155_v27, %v403_v41  ;;  %v749_v41 = vld [vmem:[%s1644_s3] sm:$0xff] }
 0x11a   : > { %v426_v44 = vmul.f32 %v1234_v32, %v1234_v32 }
 0x11c   : > { %v444_v51 = vsel %vm337_vm1, %v426_v44, 0.0 }
 0x11d   : > { %360 = vadd.xlane.f32.xlu1 %v359_v11  ;;  %v346_v29 = vpop.xlane.xlu2 %345 }
 0x11e   : > { %v395_v42 = vmul.f32 %v1204_v4, %v346_v29 }
 0x11f   : > { %v349_v18 = vpop.xlane.xlu1 %348 }
 0x120   : > { %v1257_v50 = vsub.f32 %v1162_v31, %v395_v42  ;;  %v396_v27 = vmul.f32 %v1204_v4, %v349_v18 }
 0x122   : > { %v1276_v63 = vsub.f32 %v1165_v34, %v396_v27 }
 0x125   : > { %v376_v20 = vpop.xlane.xlu2 %375 }
 0x126   : > { %v405_v57 = vmul.f32 %v1204_v4, %v376_v20 }
 0x128   : > { %v1279_v0 = vsub.f32 %v1172_v38, %v405_v57  ;;  %v428_v38 = vmul.f32 %v1276_v63, %v1276_v63 }
 0x12a   : > { %v437_v34 = vmul.f32 %v1279_v0, %v1279_v0  ;;  %v450_v12 = vsel %vm337_vm1, %v428_v38, 0.0 }
 0x12c   : > { %v477_v11 = vsel %vm337_vm1, %v437_v34, 0.0 }
 0x12d   : > { %v379_v33 = vpop.xlane.xlu1 %378 }
 0x12e   : > { %v406_v6 = vmul.f32 %v1204_v4, %v379_v33 }
 0x12f   : > { %v355_v2 = vpop.xlane.xlu2 %354 }
 0x130   : > { %v398_v5 = vmul.f32 %v1204_v4, %v355_v2 }
 0x132   : > { %v1295_v9 = vsub.f32 %v1182_v45, %v398_v5 }
 0x147   : > { %v364_v13 = vpop.xlane.xlu0 %363 }
 0x148   : > { %v401_v14 = vmul.f32 %v1204_v4, %v364_v13 }
 0x14a   : > { %v1219_v15 = vsub.f32 %v314_v54, %v401_v14  ;;  %v382_v54 = vpop.xlane.xlu1 %381  ;;  %v430_v14 = vmul.f32 %v1295_v9, %v1295_v9 }
 0x14b   : > { %v407_v59 = vmul.f32 %v1204_v4, %v382_v54 }
 0x14c   : > { %v433_v17 = vmul.f32 %v1219_v15, %v1219_v15  ;;  %v456_v45 = vsel %vm337_vm1, %v430_v14, 0.0 }
 0x14d   : > { %v1284_v3 = vsub.f32 %v1189_v49, %v407_v59  ;;  %v1298_v49 = vsub.f32 %v1179_v43, %v406_v6 }
 0x14e   : > { %v465_v19 = vsel %vm337_vm1, %v433_v17, 0.0 }
 0x14f   : > { %466 = vadd.xlane.f32.xlu0 %v465_v19  ;;  %v340_v21 = vpop.xlane.xlu0 %339  ;;  %v439_v8 = vmul.f32 %v1284_v3, %v1284_v3  ;;  %v438_v16 = vmul.f32 %v1298_v49, %v1298_v49 }
 0x150   : > { %v393_v22 = vmul.f32 %v1204_v4, %v340_v21 }
 0x151   : > { %v483_v13 = vsel %vm337_vm1, %v439_v8, 0.0  ;;  %v480_v43 = vsel %vm337_vm1, %v438_v16, 0.0 }
 0x152   : > { %v1229_v26 = vsub.f32 %v290_v56, %v393_v22  ;;  %v435_v56 = vmul.f32 %v1254_v48, %v1254_v48 }
 0x154   : > { %v425_v28 = vmul.f32 %v1229_v26, %v1229_v26  ;;  %v471_v62 = vsel %vm337_vm1, %v435_v56, 0.0 }
 0x156   : > { %v441_v36 = vsel %vm337_vm1, %v425_v28, 0.0  ;;  %v756_v28 = vld [vmem:[%s1644_s3 + $0x38] sm:$0xff] }
 0x157   : > { %357 = vadd.xlane.f32.xlu0 %v356_v35  ;;  %442 = vadd.xlane.f32.xlu2 %v441_v36  ;;  %v373_v37 = vpop.xlane.xlu0 %372  ;;  %v753_v35 = vld [vmem:[%s1644_s3 + $0x20] sm:$0xff]  ;;  %v752_v36 = vld [vmem:[%s1644_s3 + $0x18] sm:$0xff] }
 0x158   : > { %v404_v39 = vmul.f32 %v1204_v4, %v373_v37  ;;  %992 = vmatpush.msra.mxu2 %v756_v28  ;;  %815 = vmatpush.msra.mxu1 %v756_v28  ;;  %v751_v37 = vld [vmem:[%s1644_s3 + $0x10] sm:$0xff] }
 0x15a   : > { %v1245_v25 = vsub.f32 %v323_v58, %v404_v39  ;;  %v427_v58 = vmul.f32 %v1257_v50, %v1257_v50  ;;  %993 = vmatpush.msra.mxu2 %v755_v30  ;;  %816 = vmatpush.msra.mxu1 %v755_v30  ;;  %v750_v39 = vld [vmem:[%s1644_s3 + $0x8] sm:$0xff] }
 0x15c   : > { %v436_v47 = vmul.f32 %v1245_v25, %v1245_v25  ;;  %v447_v1 = vsel %vm337_vm1, %v427_v58, 0.0 }
 0x15e   : > { %v474_v52 = vsel %vm337_vm1, %v436_v47, 0.0 }
 0x15f   : > { %445 = vadd.xlane.f32.xlu0 %v444_v51  ;;  %384 = vadd.xlane.f32.xlu2 %v383_v46  ;;  %v352_v53 = vpop.xlane.xlu0 %351 }
 0x160   : > { %475 = vadd.xlane.f32.xlu1 %v474_v52  ;;  %v397_v55 = vmul.f32 %v1204_v4, %v352_v53 }
 0x162   : > { %v1267_v31 = vsub.f32 %v1200_v60, %v397_v55 }
 0x164   : > { %v429_v61 = vmul.f32 %v1267_v31, %v1267_v31 }
 0x166   : > { %v453_v60 = vsel %vm337_vm1, %v429_v61, 0.0 }
 0x167   : > { %448 = vadd.xlane.f32.xlu0 %v447_v1  ;;  %472 = vadd.xlane.f32.xlu2 %v471_v62 }
 0x168   : > { %454 = vadd.xlane.f32.xlu1 %v453_v60 }
 0x16f   : > { %478 = vadd.xlane.f32.xlu0 %v477_v11  ;;  %451 = vadd.xlane.f32.xlu2 %v450_v12 }
 0x170   : > { %484 = vadd.xlane.f32.xlu1 %v483_v13 }
 0x177   : > { %457 = vadd.xlane.f32.xlu0 %v456_v45  ;;  %481 = vadd.xlane.f32.xlu2 %v480_v43 }
 0x188   : > { %v470_v17 = vpop.xlane.xlu1 %469 }
 0x189   : > { %v498_v29 = vmul.f32 %v470_v17, %v1204_v4 }
 0x18b   : > { %v1326_v33 = vadd.f32 1e-05, %v498_v29  ;;  %v1384_v29 = vld [vmem:[%s1643_s2 + $0x1] ss:$0 sm:$0xff] }
 0x18d   : > { %1015 = vrsqrt.f32 %v1326_v33  ;;  %vm617_vm7 = vweird.f32 %v1326_v33 }
 0x190   : > { %v361_v18 = vpop.xlane.xlu1 %360 }
 0x191   : > { %v400_v19 = vmul.f32 %v1204_v4, %v361_v18 }
 0x193   : > { %v1311_v21 = vsub.f32 %v1214_v10, %v400_v19  ;;  %v754_v10 = vld [vmem:[%s1644_s3 + $0x28] sm:$0xff]  ;;  %v1344_v42 = vpop.eup %1015 }
 0x194   : > { %994 = vmatpush.msra.mxu2 %v754_v10  ;;  %817 = vmatpush.msra.mxu1 %v754_v10  ;;  %v612_v47 = vmul.f32 %v1344_v42, %v1326_v33  ;;  %vm618_vm4 = vweird.f32 %v1344_v42 }
 0x195   : > { %v432_v22 = vmul.f32 %v1311_v21, %v1311_v21  ;;  %vm1375_vm8 = vmor %vm617_vm7, %vm618_vm4 }
 0x196   : > { %995 = vmatpush.msra.mxu2 %v753_v35  ;;  %818 = vmatpush.msra.mxu1 %v753_v35  ;;  %v613_v51 = vmul.f32 %v1344_v42, %v612_v47 }
 0x197   : > { %v462_v24 = vsel %vm337_vm1, %v432_v22, 0.0 }
 0x198   : > { %463 = vadd.xlane.f32.xlu1 %v462_v24  ;;  %996 = vmatpush.msra.mxu2 %v752_v36  ;;  %v614_v27 = vmul.f32 0.5, %v613_v51 }
 0x199   : > { %819 = vmatpush.msra.mxu1 %v752_v36 }
 0x19a   : > { %997 = vmatpush.msra.mxu2 %v751_v37  ;;  %v615_v1 = vsub.f32 1.5, %v614_v27 }
 0x19b   : > { %820 = vmatpush.msra.mxu1 %v751_v37 }
 0x19c   : > { %998 = vmatpush.msra.mxu2 %v750_v39  ;;  %v616_v13 = vmul.f32 %v1344_v42, %v615_v1 }
 0x19d   : > { %821 = vmatpush.msra.mxu1 %v750_v39 }
 0x19e   : > { %999 = vmatpush.msra.mxu2 %v749_v41  ;;  %v620_v30 = vsel %vm1375_vm8, %v1344_v42, %v616_v13 }
 0x19f   : > { %822 = vmatpush.msra.mxu1 %v749_v41  ;;  %v1395_v41 = vld [vmem:[%s1643_s2 + $0x2] ss:$0 sm:$0xff] }
 0x1c2   : > { %v467_v44 = vpop.xlane.xlu0 %466 }
 0x1c3   : > { %v497_v46 = vmul.f32 %v467_v44, %v1204_v4 }
 0x1c5   : > { %v513_v20 = vadd.f32 1e-05, %v497_v46 }
 0x1c7   : > { %1017 = vrsqrt.f32 %v513_v20  ;;  %vm607_vm5 = vweird.f32 %v513_v20 }
 0x1ca   : > { %v443_v52 = vpop.xlane.xlu2 %442  ;;  %v358_v53 = vpop.xlane.xlu0 %357 }
 0x1cb   : > { %v489_v54 = vmul.f32 %v443_v52, %v1204_v4  ;;  %v399_v55 = vmul.f32 %v1204_v4, %v358_v53  ;;  %v690_v52 = vmul.f32 %v620_v30, %v1208_v7 }
 0x1cd   : > { %v1018_v56 = vpop.eup %1017  ;;  %v505_v57 = vadd.f32 1e-05, %v489_v54  ;;  %v1353_v58 = vsub.f32 %v1226_v23, %v399_v55 }
 0x1ce   : > { %v602_v59 = vmul.f32 %v1018_v56, %v513_v20  ;;  %vm608_vm3 = vweird.f32 %v1018_v56 }
 0x1cf   : > { %1019 = vrsqrt.f32 %v505_v57  ;;  %v431_v61 = vmul.f32 %v1353_v58, %v1353_v58  ;;  %vm609_vm6 = vmor %vm607_vm5, %vm608_vm3  ;;  %vm527_vm10 = vweird.f32 %v505_v57 }
 0x1d0   : > { %v603_v62 = vmul.f32 %v1018_v56, %v602_v59 }
 0x1d1   : > { %v459_v60 = vsel %vm337_vm1, %v431_v61, 0.0 }
 0x1d2   : > { %v604_v2 = vmul.f32 0.5, %v603_v62  ;;  %v385_v5 = vpop.xlane.xlu2 %384  ;;  %460 = vadd.xlane.f32.xlu2 %v459_v60  ;;  %v446_v6 = vpop.xlane.xlu0 %445  ;;  %v708_v62 = vmul.f32 %v1384_v29, %v690_v52 }
 0x1d3   : > { %v408_v34 = vmul.f32 %v1204_v4, %v385_v5  ;;  %v476_v38 = vpop.xlane.xlu1 %475  ;;  %v490_v8 = vmul.f32 %v446_v6, %v1204_v4 }
 0x1d4   : > { %v605_v23 = vsub.f32 1.5, %v604_v2  ;;  %v500_v11 = vmul.f32 %v476_v38, %v1204_v4  ;;  %v726_v13 = vadd.f32 %v1395_v41, %v708_v62 }
 0x1d5   : > { %v1020_v12 = vpop.eup %1019  ;;  %v1364_v14 = vsub.f32 %v1241_v40, %v408_v34  ;;  %v1366_v16 = vadd.f32 1e-05, %v490_v8 }
 0x1d6   : > { %v606_v45 = vmul.f32 %v1018_v56, %v605_v23  ;;  %v522_v43 = vmul.f32 %v1020_v12, %v505_v57  ;;  %v1368_v17 = vadd.f32 1e-05, %v500_v11  ;;  %vm528_vm9 = vweird.f32 %v1020_v12 }
 0x1d7   : > { %1021 = vrsqrt.f32 %v1366_v16  ;;  %v440_v18 = vmul.f32 %v1364_v14, %v1364_v14  ;;  %vm1412_vm11 = vmor %vm527_vm10, %vm528_vm9  ;;  %vm537_vm14 = vweird.f32 %v1366_v16 }
 0x1d8   : > { %v610_v19 = vsel %vm609_vm6, %v1018_v56, %v606_v45  ;;  %v523_v22 = vmul.f32 %v1020_v12, %v522_v43  ;;  %1023 = vrsqrt.f32 %v1368_v17  ;;  %vm637_vm6 = vweird.f32 %v1368_v17 }
 0x1d9   : > { %v486_v24 = vsel %vm337_vm1, %v440_v18, 0.0  ;;  %v689_v28 = vmul.f32 %v610_v19, %v1219_v15 }
 0x1da   : > { %v524_v10 = vmul.f32 0.5, %v523_v22  ;;  %487 = vadd.xlane.f32.xlu0 %v486_v24  ;;  %v473_v33 = vpop.xlane.xlu2 %472  ;;  %v449_v35 = vpop.xlane.xlu0 %448 }
 0x1db   : > { %v499_v36 = vmul.f32 %v473_v33, %v1204_v4  ;;  %v455_v37 = vpop.xlane.xlu1 %454  ;;  %v491_v39 = vmul.f32 %v449_v35, %v1204_v4  ;;  %v707_v15 = vmul.f32 %v1384_v29, %v689_v28  ;;  %v742_v33 = vmax.f32 %v726_v13, 0.0 }
 0x1dc   : > { %v525_v44 = vsub.f32 1.5, %v524_v10  ;;  %v493_v42 = vmul.f32 %v455_v37, %v1204_v4 }
 0x1dd   : > { %v1398_v46 = vpop.eup %1021  ;;  %v1400_v47 = vadd.f32 1e-05, %v499_v36  ;;  %v1402_v20 = vadd.f32 1e-05, %v491_v39  ;;  %v725_v51 = vadd.f32 %v1395_v41, %v707_v15 }
 0x1de   : > { %v1406_v53 = vpop.eup %1023  ;;  %v526_v54 = vmul.f32 %v1020_v12, %v525_v44  ;;  %v532_v55 = vmul.f32 %v1398_v46, %v1366_v16  ;;  %v1410_v56 = vadd.f32 1e-05, %v493_v42  ;;  %vm538_vm12 = vweird.f32 %v1398_v46 }
 0x1df   : > { %v632_v59 = vmul.f32 %v1406_v53, %v1368_v17  ;;  %1025 = vrsqrt.f32 %v1400_v47  ;;  %v741_v57 = vmax.f32 %v725_v51, 0.0  ;;  %vm638_vm13 = vweird.f32 %v1406_v53  ;;  %vm1455_vm15 = vmor %vm537_vm14, %vm538_vm12 }
 0x1e0   : > { %v530_v7 = vsel %vm1412_vm11, %v1020_v12, %v526_v54  ;;  %v533_v61 = vmul.f32 %v1398_v46, %v532_v55  ;;  %1027 = vrsqrt.f32 %v1410_v56  ;;  %vm627_vm3 = vweird.f32 %v1400_v47  ;;  %vm1499_vm8 = vmor %vm637_vm6, %vm638_vm13 }
 0x1e1   : > { %1029 = vrsqrt.f32 %v1402_v20  ;;  %v633_v5 = vmul.f32 %v1406_v53, %v632_v59  ;;  %978 = vmatmul.msk.f32.vlgmr.msra.gmra.mxu2 %vm337_vm1, %v741_v57  ;;  %v681_v8 = vmul.f32 %v530_v7, %v1229_v26  ;;  %vm547_vm5 = vweird.f32 %v1402_v20 }
 0x1e2   : > { %v534_v1 = vmul.f32 0.5, %v533_v61  ;;  %v452_v60 = vpop.xlane.xlu2 %451  ;;  %v479_v2 = vpop.xlane.xlu0 %478 }
 0x1e3   : > { %v492_v6 = vmul.f32 %v452_v60, %v1204_v4  ;;  %v485_v34 = vpop.xlane.xlu1 %484  ;;  %v501_v38 = vmul.f32 %v479_v2, %v1204_v4  ;;  %v634_v40 = vmul.f32 0.5, %v633_v5  ;;  %v699_v26 = vmul.f32 %v1384_v29, %v681_v8 }
 0x1e4   : > { %v535_v23 = vsub.f32 1.5, %v534_v1  ;;  %v503_v18 = vmul.f32 %v485_v34, %v1204_v4 }
 0x1e5   : > { %v1430_v11 = vpop.eup %1025  ;;  %v1432_v12 = vadd.f32 1e-05, %v492_v6  ;;  %v1440_v19 = vadd.f32 1e-05, %v501_v38  ;;  %v635_v44 = vsub.f32 1.5, %v634_v40  ;;  %v717_v16 = vadd.f32 %v1395_v41, %v699_v26 }
 0x1e6   : > { %v1435_v45 = vpop.eup %1027  ;;  %v622_v43 = vmul.f32 %v1430_v11, %v1400_v47  ;;  %v536_v24 = vmul.f32 %v1398_v46, %v535_v23  ;;  %v1452_v37 = vadd.f32 1e-05, %v503_v18  ;;  %vm628_vm0 = vweird.f32 %v1430_v11 }
 0x1e7   : > { %v1030_v22 = vpop.eup %1029  ;;  %1031 = vrsqrt.f32 %v1432_v12  ;;  %v562_v10 = vmul.f32 %v1435_v45, %v1410_v56  ;;  %v733_v61 = vmax.f32 %v717_v16, 0.0  ;;  %v636_v6 = vmul.f32 %v1406_v53, %v635_v44  ;;  %vm1484_vm4 = vmor %vm627_vm3, %vm628_vm0 }
 0x1e8   : > { %v623_v28 = vmul.f32 %v1430_v11, %v622_v43  ;;  %v542_v30 = vmul.f32 %v1030_v22, %v1402_v20  ;;  %1033 = vrsqrt.f32 %v1440_v19  ;;  %v540_v52 = vsel %vm1455_vm15, %v1398_v46, %v536_v24 }
 0x1e9   : > { %979 = vmatmul.msk.f32.gmra.mxu2 %vm337_vm1, %v742_v33  ;;  %v563_v7 = vmul.f32 %v1435_v45, %v562_v10  ;;  %vm548_vm2 = vweird.f32 %v1030_v22  ;;  %1035 = vrsqrt.f32 %v1452_v37  ;;  %970 = vmatmul.msk.f32.vlgmr.msra.gmra.mxu1 %vm337_vm1, %v733_v61  ;;  %v682_v2 = vmul.f32 %v540_v52, %v1234_v32 }
 0x1ea   : > { %v624_v35 = vmul.f32 0.5, %v623_v28  ;;  %v543_v36 = vmul.f32 %v1030_v22, %v542_v30  ;;  %v482_v39 = vpop.xlane.xlu2 %481  ;;  %v458_v15 = vpop.xlane.xlu0 %457  ;;  %vm549_vm7 = vmor %vm547_vm5, %vm548_vm2  ;;  %vm557_vm10 = vweird.f32 %v1432_v12  ;;  %vm568_vm13 = vweird.f32 %v1435_v45 }
 0x1eb   : > { %v502_v51 = vmul.f32 %v482_v39, %v1204_v4  ;;  %v494_v27 = vmul.f32 %v458_v15, %v1204_v4  ;;  %v564_v23 = vmul.f32 0.5, %v563_v7  ;;  %vm647_vm14 = vweird.f32 %v1440_v19 }
 0x1ec   : > { %v625_v54 = vsub.f32 1.5, %v624_v35  ;;  %v544_v55 = vmul.f32 0.5, %v543_v36  ;;  %vm567_vm0 = vweird.f32 %v1410_v56 }
 0x1ed   : > { %v1032_v59 = vpop.eup %1031  ;;  %v1468_v57 = vadd.f32 1e-05, %v502_v51  ;;  %v1476_v46 = vadd.f32 1e-05, %v494_v27  ;;  %v565_v35 = vsub.f32 1.5, %v564_v23  ;;  %vm569_vm2 = vmor %vm567_vm0, %vm568_vm13 }
 0x1ee   : > { %v626_v62 = vmul.f32 %v1430_v11, %v625_v54  ;;  %v545_v1 = vsub.f32 1.5, %v544_v55  ;;  %v552_v60 = vmul.f32 %v1032_v59, %v1432_v12  ;;  %v1479_v5 = vpop.eup %1033  ;;  %vm558_vm9 = vweird.f32 %v1032_v59 }
 0x1ef   : > { %1037 = vrsqrt.f32 %v1468_v57  ;;  %v642_v8 = vmul.f32 %v1479_v5, %v1440_v19  ;;  %v1506_v40 = vpop.eup %1035  ;;  %vm1519_vm11 = vmor %vm557_vm10, %vm558_vm9  ;;  %vm648_vm12 = vweird.f32 %v1479_v5  ;;  %v566_v7 = vmul.f32 %v1435_v45, %v565_v35 }
 0x1f0   : > { %v546_v38 = vmul.f32 %v1030_v22, %v545_v1  ;;  %v553_v47 = vmul.f32 %v1032_v59, %v552_v60  ;;  %v630_v32 = vsel %vm1484_vm4, %v1430_v11, %v626_v62  ;;  %1039 = vrsqrt.f32 %v1476_v46  ;;  %vm649_vm15 = vmor %vm647_vm14, %vm648_vm12 }
 0x1f1   : > { %v643_v17 = vmul.f32 %v1479_v5, %v642_v8  ;;  %v700_v11 = vmul.f32 %v1384_v29, %v682_v2  ;;  %v691_v24 = vmul.f32 %v630_v32, %v1254_v48  ;;  %v662_v12 = vmul.f32 %v1506_v40, %v1452_v37 }
 0x1f2   : > { %v550_v13 = vsel %vm549_vm7, %v1030_v22, %v546_v38  ;;  %v554_v43 = vmul.f32 0.5, %v553_v47  ;;  %v640_v22 = vsel %vm1499_vm8, %v1406_v53, %v636_v6  ;;  %v570_v19 = vsel %vm569_vm2, %v1435_v45, %v566_v7 }
 0x1f3   : > { %v683_v18 = vmul.f32 %v550_v13, %v1257_v50  ;;  %v644_v30 = vmul.f32 0.5, %v643_v17  ;;  %v718_v10 = vadd.f32 %v1395_v41, %v700_v11  ;;  %v709_v15 = vmul.f32 %v1384_v29, %v691_v24 }
 0x1f4   : > { %v555_v26 = vsub.f32 1.5, %v554_v43  ;;  %v692_v44 = vmul.f32 %v640_v22, %v1245_v25  ;;  %v663_v62 = vmul.f32 %v1506_v40, %v662_v12  ;;  %vm657_vm4 = vweird.f32 %v1468_v57 }
 0x1f5   : > { %v1512_v28 = vpop.eup %1037  ;;  %v701_v33 = vmul.f32 %v1384_v29, %v683_v18  ;;  %v645_v39 = vsub.f32 1.5, %v644_v30  ;;  %v734_v48 = vmax.f32 %v718_v10, 0.0  ;;  %v727_v27 = vadd.f32 %v1395_v41, %v709_v15 }
 0x1f6   : > { %v556_v36 = vmul.f32 %v1032_v59, %v555_v26  ;;  %v652_v50 = vmul.f32 %v1512_v28, %v1468_v57  ;;  %v1040_v42 = vpop.eup %1039  ;;  %v710_v2 = vmul.f32 %v1384_v29, %v692_v44  ;;  %v664_v23 = vmul.f32 0.5, %v663_v62 }
 0x1f7   : > { %v719_v52 = vadd.f32 %v1395_v41, %v701_v33  ;;  %v646_v54 = vmul.f32 %v1479_v5, %v645_v39  ;;  %v572_v55 = vmul.f32 %v1040_v42, %v1476_v46  ;;  %971 = vmatmul.msk.f32.gmra.mxu1 %vm337_vm1, %v734_v48  ;;  %v743_v60 = vmax.f32 %v727_v27, 0.0 }
 0x1f8   : > { %v560_v16 = vsel %vm1519_vm11, %v1032_v59, %v556_v36  ;;  %v653_v51 = vmul.f32 %v1512_v28, %v652_v50  ;;  %v728_v32 = vadd.f32 %v1395_v41, %v710_v2  ;;  %vm658_vm3 = vweird.f32 %v1512_v28 }
 0x1f9   : > { %v684_v59 = vmul.f32 %v560_v16, %v1276_v63  ;;  %v573_v61 = vmul.f32 %v1040_v42, %v572_v55  ;;  %v735_v1 = vmax.f32 %v719_v52, 0.0  ;;  %v650_v6 = vsel %vm649_vm15, %v1479_v5, %v646_v54  ;;  %980 = vmatmul.msk.f32.gmra.mxu2 %vm337_vm1, %v743_v60  ;;  %vm659_vm5 = vmor %vm657_vm4, %vm658_vm3 }
 0x1fa   : > { %v654_v25 = vmul.f32 0.5, %v653_v51  ;;  %v693_v8 = vmul.f32 %v650_v6, %v1279_v0  ;;  %v685_v56 = vmul.f32 %v570_v19, %v1267_v31  ;;  %vm578_vm6 = vweird.f32 %v1040_v42 }
 0x1fb   : > { %v574_v38 = vmul.f32 0.5, %v573_v61  ;;  %v702_v63 = vmul.f32 %v1384_v29, %v684_v59  ;;  %v744_v43 = vmax.f32 %v728_v32, 0.0  ;;  %v665_v0 = vsub.f32 1.5, %v664_v23 }
 0x1fc   : > { %v655_v34 = vsub.f32 1.5, %v654_v25  ;;  %v711_v20 = vmul.f32 %v1384_v29, %v693_v8  ;;  %vm577_vm7 = vweird.f32 %v1476_v46  ;;  %v703_v18 = vmul.f32 %v1384_v29, %v685_v56 }
 0x1fd   : > { %v575_v47 = vsub.f32 1.5, %v574_v38  ;;  %v720_v5 = vadd.f32 %v1395_v41, %v702_v63  ;;  %vm579_vm8 = vmor %vm577_vm7, %vm578_vm6  ;;  %v666_v26 = vmul.f32 %v1506_v40, %v665_v0  ;;  %vm668_vm9 = vweird.f32 %v1506_v40 }
 0x1fe   : > { %v656_v13 = vmul.f32 %v1512_v28, %v655_v34  ;;  %v729_v31 = vadd.f32 %v1395_v41, %v711_v20  ;;  %vm667_vm10 = vweird.f32 %v1452_v37  ;;  %v721_v46 = vadd.f32 %v1395_v41, %v703_v18 }
 0x1ff   : > { %972 = vmatmul.msk.f32.gmra.mxu1 %vm337_vm1, %v735_v1  ;;  %v576_v45 = vmul.f32 %v1040_v42, %v575_v47  ;;  %v736_v11 = vmax.f32 %v720_v5, 0.0  ;;  %vm669_vm11 = vmor %vm667_vm10, %vm668_vm9  ;;  %vm872_vm6 = vcmask 130048  }
 0x200   : > { %v660_v17 = vsel %vm659_vm5, %v1512_v28, %v656_v13  ;;  %v745_v28 = vmax.f32 %v729_v31, 0.0  ;;  %v670_v10 = vsel %vm669_vm11, %v1506_v40, %v666_v26 }
 0x201   : > { %981 = vmatmul.msk.f32.gmra.mxu2 %vm337_vm1, %v744_v43  ;;  %v580_v57 = vsel %vm579_vm8, %v1040_v42, %v576_v45  ;;  %v694_v22 = vmul.f32 %v660_v17, %v1298_v49  ;;  %v737_v49 = vmax.f32 %v721_v46, 0.0  ;;  %v695_v36 = vmul.f32 %v670_v10, %v1284_v3 }
 0x202   : > { %v686_v24 = vmul.f32 %v580_v57, %v1295_v9 }
 0x203   : > { %v712_v30 = vmul.f32 %v1384_v29, %v694_v22  ;;  %v713_v50 = vmul.f32 %v1384_v29, %v695_v36 }
 0x204   : > { %v704_v33 = vmul.f32 %v1384_v29, %v686_v24 }
 0x205   : > { %v730_v35 = vadd.f32 %v1395_v41, %v712_v30  ;;  %v731_v40 = vadd.f32 %v1395_v41, %v713_v50 }
 0x206   : > { %v722_v37 = vadd.f32 %v1395_v41, %v704_v33 }
 0x207   : > { %973 = vmatmul.msk.f32.gmra.mxu1 %vm337_vm1, %v736_v11  ;;  %v746_v9 = vmax.f32 %v730_v35, 0.0  ;;  %v747_v39 = vmax.f32 %v731_v40, 0.0 }
 0x208   : > { %v738_v53 = vmax.f32 %v722_v37, 0.0 }
 0x209   : > { %982 = vmatmul.msk.f32.gmra.mxu2 %vm337_vm1, %v745_v28 }
 0x20b   : > { %v464_v48 = vpop.xlane.xlu1 %463 }
 0x20c   : > { %v496_v3 = vmul.f32 %v464_v48, %v1204_v4 }
 0x20e   : > { %v512_v15 = vadd.f32 1e-05, %v496_v3 }
 0x20f   : > { %974 = vmatmul.msk.f32.gmra.mxu1 %vm337_vm1, %v737_v49 }
 0x210   : > { %1041 = vrsqrt.f32 %v512_v15  ;;  %vm597_vm14 = vweird.f32 %v512_v15 }
 0x211   : > { %983 = vmatmul.msk.f32.gmra.mxu2 %vm337_vm1, %v746_v9 }
 0x216   : > { %v1042_v44 = vpop.eup %1041 }
 0x217   : > { %975 = vmatmul.msk.f32.gmra.mxu1 %vm337_vm1, %v738_v53  ;;  %v592_v12 = vmul.f32 %v1042_v44, %v512_v15  ;;  %vm598_vm12 = vweird.f32 %v1042_v44 }
 0x218   : > { %vm599_vm15 = vmor %vm597_vm14, %vm598_vm12 }
 0x219   : > { %984 = vmatmul.msk.f32.gmra.mxu2 %vm337_vm1, %v747_v39  ;;  %v593_v52 = vmul.f32 %v1042_v44, %v592_v12 }
 0x21b   : > { %v594_v25 = vmul.f32 0.5, %v593_v52 }
 0x21d   : > { %v595_v61 = vsub.f32 1.5, %v594_v25 }
 0x21f   : > { %v596_v60 = vmul.f32 %v1042_v44, %v595_v61 }
 0x245   : > { %v461_v42 = vpop.xlane.xlu2 %460 }
 0x246   : > { %v495_v16 = vmul.f32 %v461_v42, %v1204_v4 }
 0x248   : > { %v511_v51 = vadd.f32 1e-05, %v495_v16 }
 0x24a   : > { %1043 = vrsqrt.f32 %v511_v51  ;;  %vm587_vm0 = vweird.f32 %v511_v51 }
 0x24d   : > { %v488_v54 = vpop.xlane.xlu0 %487 }
 0x24e   : > { %v504_v55 = vmul.f32 %v488_v54, %v1204_v4  ;;  %v600_v4 = vsel %vm599_vm15, %v1042_v44, %v596_v60 }
 0x24f   : > { %v688_v23 = vmul.f32 %v600_v4, %v1311_v21 }
 0x250   : > { %v1044_v27 = vpop.eup %1043  ;;  %v520_v59 = vadd.f32 1e-05, %v504_v55 }
 0x251   : > { %v582_v7 = vmul.f32 %v1044_v27, %v511_v51  ;;  %vm588_vm13 = vweird.f32 %v1044_v27  ;;  %v706_v43 = vmul.f32 %v1384_v29, %v688_v23 }
 0x252   : > { %1045 = vrsqrt.f32 %v520_v59  ;;  %vm589_vm2 = vmor %vm587_vm0, %vm588_vm13  ;;  %vm677_vm4 = vweird.f32 %v520_v59 }
 0x253   : > { %v583_v62 = vmul.f32 %v1044_v27, %v582_v7  ;;  %v724_v17 = vadd.f32 %v1395_v41, %v706_v43 }
 0x255   : > { %v584_v1 = vmul.f32 0.5, %v583_v62 }
 0x257   : > { %v585_v2 = vsub.f32 1.5, %v584_v1 }
 0x258   : > { %v1046_v6 = vpop.eup %1045 }
 0x259   : > { %v586_v34 = vmul.f32 %v1044_v27, %v585_v2  ;;  %v672_v38 = vmul.f32 %v1046_v6, %v520_v59  ;;  %vm678_vm3 = vweird.f32 %v1046_v6 }
 0x25a   : > { %vm679_vm5 = vmor %vm677_vm4, %vm678_vm3 }
 0x25b   : > { %v590_v63 = vsel %vm589_vm2, %v1044_v27, %v586_v34  ;;  %v673_v19 = vmul.f32 %v1046_v6, %v672_v38 }
 0x25c   : > { %v687_v47 = vmul.f32 %v590_v63, %v1353_v58  ;;  %v1012_v58 = vld [vmem:[%s1643_s2 + $0x3] ss:$0 sm:$0xff] }
 0x25d   : > { %v674_v32 = vmul.f32 0.5, %v673_v19 }
 0x25e   : > { %v705_v8 = vmul.f32 %v1384_v29, %v687_v47 }
 0x25f   : > { %v675_v13 = vsub.f32 1.5, %v674_v32 }
 0x260   : > { %v723_v5 = vadd.f32 %v1395_v41, %v705_v8 }
 0x261   : > { %v676_v56 = vmul.f32 %v1046_v6, %v675_v13 }
 0x262   : > { %v739_v45 = vmax.f32 %v723_v5, 0.0 }
 0x263   : > { %v680_v20 = vsel %vm679_vm5, %v1046_v6, %v676_v56 }
 0x264   : > { %976 = vmatmul.msk.f32.gmra.mxu1 %vm337_vm1, %v739_v45  ;;  %v696_v0 = vmul.f32 %v680_v20, %v1364_v14  ;;  %v848_v21 = vpop.f32.mrf.mxu2  ;;  %v740_v14 = vmax.f32 %v724_v17, 0.0 }
 0x265   : > { %v849_v18 = vadd.f32 %v1012_v58, %v848_v21 }
 0x266   : > { %v714_v11 = vmul.f32 %v1384_v29, %v696_v0  ;;  %v824_v22 = vpop.f32.mrf.mxu1 }
 0x267   : > { %881 = vst.msk [vmem:[%s1599_s7 + $0x40] sm:$0xff] %vm872_vm6, %v849_v18  ;;  %v825_v26 = vadd.f32 %v1012_v58, %v824_v22 }
 0x268   : > { %v732_v57 = vadd.f32 %v1395_v41, %v714_v11 }
 0x269   : > { %873 = vst.msk [vmem:[%s1599_s7] sm:$0xff] %vm872_vm6, %v825_v26 }
 0x26a   : > { %v748_v31 = vmax.f32 %v732_v57, 0.0 }
 0x26c   : > { %977 = vmatmul.msk.f32.gmra.mxu1 %vm337_vm1, %v740_v14  ;;  %985 = vmatmul.msk.f32.gmra.mxu2 %vm337_vm1, %v748_v31  ;;  %v851_v46 = vpop.f32.mrf.mxu2 }
 0x26d   : > { %v852_v29 = vadd.f32 %v1012_v58, %v851_v46 }
 0x26f   : > { %882 = vst.msk [vmem:[%s1599_s7 + $0x48] sm:$0xff] %vm872_vm6, %v852_v29 }
 0x274   : > { %v827_v41 = vpop.f32.mrf.mxu1 }
 0x275   : > { %v828_v24 = vadd.f32 %v1012_v58, %v827_v41 }
 0x277   : > { %874 = vst.msk [vmem:[%s1599_s7 + $0x8] sm:$0xff] %vm872_vm6, %v828_v24 }
 0x27c   : > { %v830_v28 = vpop.f32.mrf.mxu1  ;;  %v854_v10 = vpop.f32.mrf.mxu2 }
 0x27d   : > { %v831_v30 = vadd.f32 %v1012_v58, %v830_v28  ;;  %v855_v49 = vadd.f32 %v1012_v58, %v854_v10 }
 0x27f   : > { %875 = vst.msk [vmem:[%s1599_s7 + $0x10] sm:$0xff] %vm872_vm6, %v831_v30 }
 0x280   : > { %883 = vst.msk [vmem:[%s1599_s7 + $0x50] sm:$0xff] %vm872_vm6, %v855_v49 }
 0x284   : > { %v833_v33 = vpop.f32.mrf.mxu1  ;;  %v857_v36 = vpop.f32.mrf.mxu2 }
 0x285   : > { %v834_v35 = vadd.f32 %v1012_v58, %v833_v33  ;;  %v858_v37 = vadd.f32 %v1012_v58, %v857_v36 }
 0x287   : > { %876 = vst.msk [vmem:[%s1599_s7 + $0x18] sm:$0xff] %vm872_vm6, %v834_v35 }
 0x288   : > { %884 = vst.msk [vmem:[%s1599_s7 + $0x58] sm:$0xff] %vm872_vm6, %v858_v37 }
 0x28c   : > { %v836_v9 = vpop.f32.mrf.mxu1  ;;  %v860_v53 = vpop.f32.mrf.mxu2 }
 0x28d   : > { %v837_v50 = vadd.f32 %v1012_v58, %v836_v9  ;;  %v861_v40 = vadd.f32 %v1012_v58, %v860_v53 }
 0x28f   : > { %877 = vst.msk [vmem:[%s1599_s7 + $0x20] sm:$0xff] %vm872_vm6, %v837_v50 }
 0x290   : > { %885 = vst.msk [vmem:[%s1599_s7 + $0x60] sm:$0xff] %vm872_vm6, %v861_v40 }
 0x294   : > { %v839_v39 = vpop.f32.mrf.mxu1  ;;  %v863_v3 = vpop.f32.mrf.mxu2 }
 0x295   : > { %v840_v48 = vadd.f32 %v1012_v58, %v839_v39  ;;  %v864_v15 = vadd.f32 %v1012_v58, %v863_v3 }
 0x297   : > { %878 = vst.msk [vmem:[%s1599_s7 + $0x28] sm:$0xff] %vm872_vm6, %v840_v48 }
 0x298   : > { %886 = vst.msk [vmem:[%s1599_s7 + $0x68] sm:$0xff] %vm872_vm6, %v864_v15 }
 0x29c   : > { %v866_v44 = vpop.f32.mrf.mxu2 }
 0x29d   : > { %v867_v42 = vadd.f32 %v1012_v58, %v866_v44 }
 0x29f   : > { %887 = vst.msk [vmem:[%s1599_s7 + $0x70] sm:$0xff] %vm872_vm6, %v867_v42 }
 0x2e1   : > { %v842_v16 = vpop.f32.mrf.mxu1 }
 0x2e2   : > { %v843_v12 = vadd.f32 %v1012_v58, %v842_v16 }
 0x2e4   : > { %879 = vst.msk [vmem:[%s1599_s7 + $0x30] sm:$0xff] %vm872_vm6, %v843_v12 }
 0x2e9   : > { %v845_v51 = vpop.f32.mrf.mxu1 }
 0x2ea   : > { %v846_v52 = vadd.f32 %v1012_v58, %v845_v51 }
 0x2ec   : > { %880 = vst.msk [vmem:[%s1599_s7 + $0x38] sm:$0xff] %vm872_vm6, %v846_v52 }
 0x2ef   : > { %v869_v54 = vpop.f32.mrf.mxu2 }
 0x2f0   : > { %v870_v55 = vadd.f32 %v1012_v58, %v869_v54 }
 0x2f2   : > { %888 = vst.msk [vmem:[%s1599_s7 + $0x78] sm:$0xff] %vm872_vm6, %v870_v55 }
 0x2f3 PF: > { %s14_s15 = sadd.s32 1, %s1053_s15  }
 0x2f4   : > { %p11_p4 = scmp.ge.s32.totalorder %s14_s15, 4  }
 0x2f6   :  { %13 = sbr.rel (!%p11_p4) target bundleno = 1 (0x1), region = 66 }

</bundles_post_ra>
